<compile_context>
chip_gen: v5e
topology: v5e:2x2
jax: 0.10.0
libtpu: 0.0.40
codegen_flags: <defaults>
</compile_context>

<pallas_src>
import functools

import jax
import jax.numpy as jnp
from jax.experimental import pallas as pl
from jax.experimental.pallas import tpu as pltpu

_IN_FEATURES = 63  # 21 landmarks x 3 coords


def _round_up(x, m):
    return (x + m - 1) // m * m


def _mlp_kernel(x_ref,
                w1_ref, b1_ref,
                w2_ref, b2_ref,
                w3_ref, b3_ref,
                w4_ref, b4_ref,
                w5_ref, b5_ref,
                o_ref):
    """Fused 5-layer MLP on one batch tile.

    Matmuls run on the MXU with bf16 operands and f32 accumulation; bias-add
    and ReLU are f32 VPU ops (v5e-safe).  Input is cast f32 -> bf16 in-kernel.
    """
    cdt = w1_ref.dtype  # bf16 compute dtype for matmul operands

    h = x_ref[...].astype(cdt)  # (tile, 63) bf16

    for w_ref, b_ref in ((w1_ref, b1_ref), (w2_ref, b2_ref),
                         (w3_ref, b3_ref), (w4_ref, b4_ref)):
        h = jnp.dot(h, w_ref[...], preferred_element_type=jnp.float32) + b_ref[...]
        h = jnp.maximum(h, 0.0).astype(cdt)

    logits = jnp.dot(h, w5_ref[...], preferred_element_type=jnp.float32) + b5_ref[...]
    o_ref[...] = logits.astype(o_ref.dtype)  # (tile, num_classes) f32


@functools.partial(jax.jit, static_argnames=("batch_tile",))
def _forward_impl(x, params, *, batch_tile):
    B = x.shape[0]
    x2d = x.reshape(B, -1)
    assert x2d.shape[1] == _IN_FEATURES, f"expected 63 features, got {x2d.shape[1]}"
    num_classes = params["w5"].shape[1]

    b_pad = _round_up(B, batch_tile)
    if b_pad != B:
        # Row-only padding; fuses with neighbors under jit.
        x2d = jnp.zeros((b_pad, _IN_FEATURES), x2d.dtype).at[:B].set(x2d)
    grid = b_pad // batch_tile

    # Batch-tiled input/output; full-array constant-index blocks for the small
    # weights/biases (resident across the grid, DMA'd once).
    in_specs = [pl.BlockSpec((batch_tile, _IN_FEATURES), lambda i: (i, 0))]
    args = [x2d]
    for k in ("w1", "b1", "w2", "b2", "w3", "b3", "w4", "b4", "w5", "b5"):
        arr = params[k]
        in_specs.append(pl.BlockSpec(arr.shape, lambda i: (0, 0)))
        args.append(arr)

    out = pl.pallas_call(
        _mlp_kernel,
        out_shape=jax.ShapeDtypeStruct((b_pad, num_classes), jnp.float32),
        grid_spec=pltpu.PrefetchScalarGridSpec(
            num_scalar_prefetch=0,
            grid=(grid,),
            in_specs=in_specs,
            out_specs=pl.BlockSpec((batch_tile, num_classes), lambda i: (i, 0)),
        ),
        compiler_params=pltpu.CompilerParams(
            dimension_semantics=("parallel",),
            vmem_limit_bytes=32 << 20,
        ),
    )(*args)

    return out[:B] if b_pad != B else out


def landmark_ann_forward(x, params, num_classes=None, *, batch_tile=None):
    """x: (B, 21, 3) or (B, 63) f32. params: dict of (in,out) bf16 W, (1,out) f32 b."""
    B = x.shape[0]
    if batch_tile is None:
        # Up to 2048 rows per tile (VMEM-safe everywhere); sized ~ceil(B/2) so
        # large batches produce >= 2 grid steps for v7x's two TensorCores.
        batch_tile = min(2048, _round_up(max(-(-B // 2), 1), 16))
    # bf16 packs 16 rows per sublane tile -> align to 16 (never 8).
    batch_tile = max(16, _round_up(int(batch_tile), 16))

    out = _forward_impl(x, params, batch_tile=batch_tile)
    if num_classes is not None:
        assert out.shape[1] == num_classes
    return out


def init_params(key, num_classes):
    """Deterministic synthetic parameters: bf16 (in,out) weights, f32 (1,out) biases."""
    dims = [(63, 256), (256, 128), (128, 64), (64, 32), (32, num_classes)]
    params = {}
    for idx, (fan_in, fan_out) in enumerate(dims, start=1):
        key, kw, kb = jax.random.split(key, 3)
        bound = 1.0 / jnp.sqrt(fan_in)
        # PyTorch Linear stores W as (out, in); we keep the transposed (in, out).
        w = jax.random.uniform(kw, (fan_in, fan_out), jnp.float32, -bound, bound)
        b = jax.random.uniform(kb, (1, fan_out), jnp.float32, -bound, bound)
        params[f"w{idx}"] = w.astype(jnp.bfloat16)
        params[f"b{idx}"] = b  # biases stay f32
    return params


def reference_forward(x, params):
    """Pure-JAX reference with identical dtype discipline (bf16 matmul, f32 acc)."""
    h = x.reshape(x.shape[0], -1).astype(jnp.bfloat16)
    for i in range(1, 5):
        h = jnp.dot(h, params[f"w{i}"], preferred_element_type=jnp.float32) + params[f"b{i}"]
        h = jnp.maximum(h, 0.0).astype(jnp.bfloat16)
    return jnp.dot(h, params["w5"], preferred_element_type=jnp.float32) + params["b5"]


if __name__ == "__main__":
    key = jax.random.PRNGKey(0)
    k_param, k_x1, k_x2 = jax.random.split(key, 3)

    num_classes = 10
    params = init_params(k_param, num_classes)

    # Case 1: small batch, single grid step. 21 hand landmarks x 3 coords.
    x1 = jax.random.normal(k_x1, (8, 21, 3), jnp.float32)
    out1 = jax.block_until_ready(landmark_ann_forward(x1, params, num_classes))
    ref1 = reference_forward(x1, params)
    assert out1.shape == (8, num_classes)
    assert jnp.allclose(out1, ref1, atol=2e-3, rtol=2e-3), "mismatch vs reference (case 1)"

    # Case 2: ragged batch (45 -> padded to 48) with an explicit 16-row tile
    # (exercises grid > 1, the batch zero-padding path, and multi-step output).
    x2 = jax.random.normal(k_x2, (45, 21, 3), jnp.float32)
    out2 = jax.block_until_ready(
        landmark_ann_forward(x2, params, num_classes, batch_tile=16))
    ref2 = reference_forward(x2, params)
    assert out2.shape == (45, num_classes)
    assert jnp.allclose(out2, ref2, atol=2e-3, rtol=2e-3), "mismatch vs reference (case 2)"

    print("KERNEL_OK")
</pallas_src>

<mosaic_0001>
module attributes {stable_mosaic.version = 11 : i64} {
  func.func @_mlp_kernel(%arg0: i32, %arg1: memref<16x63xf32, #tpu.memory_space<vmem>>, %arg2: memref<63x256xbf16, #tpu.memory_space<vmem>>, %arg3: memref<1x256xf32, #tpu.memory_space<vmem>>, %arg4: memref<256x128xbf16, #tpu.memory_space<vmem>>, %arg5: memref<1x128xf32, #tpu.memory_space<vmem>>, %arg6: memref<128x64xbf16, #tpu.memory_space<vmem>>, %arg7: memref<1x64xf32, #tpu.memory_space<vmem>>, %arg8: memref<64x32xbf16, #tpu.memory_space<vmem>>, %arg9: memref<1x32xf32, #tpu.memory_space<vmem>>, %arg10: memref<32x10xbf16, #tpu.memory_space<vmem>>, %arg11: memref<1x10xf32, #tpu.memory_space<vmem>>, %arg12: memref<16x10xf32, #tpu.memory_space<vmem>>) attributes {dimension_semantics = [#tpu.dimension_semantics<parallel>], iteration_bounds = array<i64: 1>, scalar_prefetch = 0 : i64, scratch_operands = 0 : i64, tpu.core_type = #tpu.core_type<tc>, window_params = [{transform_indices = @transform_0, window_bounds = array<i64: 16, 63>}, {pipeline_mode = #tpu.pipeline_mode<synchronous>, transform_indices = @transform_1, window_bounds = array<i64: 63, 256>}, {pipeline_mode = #tpu.pipeline_mode<synchronous>, transform_indices = @transform_2, window_bounds = array<i64: 1, 256>}, {pipeline_mode = #tpu.pipeline_mode<synchronous>, transform_indices = @transform_3, window_bounds = array<i64: 256, 128>}, {pipeline_mode = #tpu.pipeline_mode<synchronous>, transform_indices = @transform_4, window_bounds = array<i64: 1, 128>}, {pipeline_mode = #tpu.pipeline_mode<synchronous>, transform_indices = @transform_5, window_bounds = array<i64: 128, 64>}, {pipeline_mode = #tpu.pipeline_mode<synchronous>, transform_indices = @transform_6, window_bounds = array<i64: 1, 64>}, {pipeline_mode = #tpu.pipeline_mode<synchronous>, transform_indices = @transform_7, window_bounds = array<i64: 64, 32>}, {pipeline_mode = #tpu.pipeline_mode<synchronous>, transform_indices = @transform_8, window_bounds = array<i64: 1, 32>}, {pipeline_mode = #tpu.pipeline_mode<synchronous>, transform_indices = @transform_9, window_bounds = array<i64: 32, 10>}, {pipeline_mode = #tpu.pipeline_mode<synchronous>, transform_indices = @transform_10, window_bounds = array<i64: 1, 10>}, {transform_indices = @transform_11, window_bounds = array<i64: 16, 10>}]} {
    %c0 = arith.constant 0 : index
    %c0_0 = arith.constant 0 : index
    %0 = vector.load %arg1[%c0, %c0_0] : memref<16x63xf32, #tpu.memory_space<vmem>>, vector<16x63xf32>
    %1 = arith.truncf %0 : vector<16x63xf32> to vector<16x63xbf16>
    %c0_1 = arith.constant 0 : index
    %c0_2 = arith.constant 0 : index
    %2 = vector.load %arg2[%c0_1, %c0_2] : memref<63x256xbf16, #tpu.memory_space<vmem>>, vector<63x256xbf16>
    %cst = arith.constant dense<0.000000e+00> : vector<16x256xf32>
    %3 = tpu.matmul %1, %2, %cst {dimension_numbers = #tpu.dot_dimension_numbers<[1], [0], [0], [1], [0, 0, 1, 1], [], []>} : vector<16x63xbf16>, vector<63x256xbf16>, vector<16x256xf32> -> vector<16x256xf32>
    %c0_3 = arith.constant 0 : index
    %c0_4 = arith.constant 0 : index
    %4 = vector.load %arg3[%c0_3, %c0_4] : memref<1x256xf32, #tpu.memory_space<vmem>>, vector<1x256xf32>
    %5 = vector.broadcast %4 : vector<1x256xf32> to vector<16x256xf32>
    %6 = arith.addf %3, %5 : vector<16x256xf32>
    %cst_5 = arith.constant 0.000000e+00 : f32
    %7 = vector.broadcast %cst_5 : f32 to vector<16x256xf32>
    %8 = arith.maximumf %6, %7 : vector<16x256xf32>
    %9 = arith.truncf %8 : vector<16x256xf32> to vector<16x256xbf16>
    %c0_6 = arith.constant 0 : index
    %c0_7 = arith.constant 0 : index
    %10 = vector.load %arg4[%c0_6, %c0_7] : memref<256x128xbf16, #tpu.memory_space<vmem>>, vector<256x128xbf16>
    %cst_8 = arith.constant dense<0.000000e+00> : vector<16x128xf32>
    %11 = tpu.matmul %9, %10, %cst_8 {dimension_numbers = #tpu.dot_dimension_numbers<[1], [0], [0], [1], [0, 0, 1, 1], [], []>} : vector<16x256xbf16>, vector<256x128xbf16>, vector<16x128xf32> -> vector<16x128xf32>
    %c0_9 = arith.constant 0 : index
    %c0_10 = arith.constant 0 : index
    %12 = vector.load %arg5[%c0_9, %c0_10] : memref<1x128xf32, #tpu.memory_space<vmem>>, vector<1x128xf32>
    %13 = vector.broadcast %12 : vector<1x128xf32> to vector<16x128xf32>
    %14 = arith.addf %11, %13 : vector<16x128xf32>
    %cst_11 = arith.constant 0.000000e+00 : f32
    %15 = vector.broadcast %cst_11 : f32 to vector<16x128xf32>
    %16 = arith.maximumf %14, %15 : vector<16x128xf32>
    %17 = arith.truncf %16 : vector<16x128xf32> to vector<16x128xbf16>
    %c0_12 = arith.constant 0 : index
    %c0_13 = arith.constant 0 : index
    %18 = vector.load %arg6[%c0_12, %c0_13] : memref<128x64xbf16, #tpu.memory_space<vmem>>, vector<128x64xbf16>
    %cst_14 = arith.constant dense<0.000000e+00> : vector<16x64xf32>
    %19 = tpu.matmul %17, %18, %cst_14 {dimension_numbers = #tpu.dot_dimension_numbers<[1], [0], [0], [1], [0, 0, 1, 1], [], []>} : vector<16x128xbf16>, vector<128x64xbf16>, vector<16x64xf32> -> vector<16x64xf32>
    %c0_15 = arith.constant 0 : index
    %c0_16 = arith.constant 0 : index
    %20 = vector.load %arg7[%c0_15, %c0_16] : memref<1x64xf32, #tpu.memory_space<vmem>>, vector<1x64xf32>
    %21 = vector.broadcast %20 : vector<1x64xf32> to vector<16x64xf32>
    %22 = arith.addf %19, %21 : vector<16x64xf32>
    %cst_17 = arith.constant 0.000000e+00 : f32
    %23 = vector.broadcast %cst_17 : f32 to vector<16x64xf32>
    %24 = arith.maximumf %22, %23 : vector<16x64xf32>
    %25 = arith.truncf %24 : vector<16x64xf32> to vector<16x64xbf16>
    %c0_18 = arith.constant 0 : index
    %c0_19 = arith.constant 0 : index
    %26 = vector.load %arg8[%c0_18, %c0_19] : memref<64x32xbf16, #tpu.memory_space<vmem>>, vector<64x32xbf16>
    %cst_20 = arith.constant dense<0.000000e+00> : vector<16x32xf32>
    %27 = tpu.matmul %25, %26, %cst_20 {dimension_numbers = #tpu.dot_dimension_numbers<[1], [0], [0], [1], [0, 0, 1, 1], [], []>} : vector<16x64xbf16>, vector<64x32xbf16>, vector<16x32xf32> -> vector<16x32xf32>
    %c0_21 = arith.constant 0 : index
    %c0_22 = arith.constant 0 : index
    %28 = vector.load %arg9[%c0_21, %c0_22] : memref<1x32xf32, #tpu.memory_space<vmem>>, vector<1x32xf32>
    %29 = vector.broadcast %28 : vector<1x32xf32> to vector<16x32xf32>
    %30 = arith.addf %27, %29 : vector<16x32xf32>
    %cst_23 = arith.constant 0.000000e+00 : f32
    %31 = vector.broadcast %cst_23 : f32 to vector<16x32xf32>
    %32 = arith.maximumf %30, %31 : vector<16x32xf32>
    %33 = arith.truncf %32 : vector<16x32xf32> to vector<16x32xbf16>
    %c0_24 = arith.constant 0 : index
    %c0_25 = arith.constant 0 : index
    %34 = vector.load %arg10[%c0_24, %c0_25] : memref<32x10xbf16, #tpu.memory_space<vmem>>, vector<32x10xbf16>
    %cst_26 = arith.constant dense<0.000000e+00> : vector<16x10xf32>
    %35 = tpu.matmul %33, %34, %cst_26 {dimension_numbers = #tpu.dot_dimension_numbers<[1], [0], [0], [1], [0, 0, 1, 1], [], []>} : vector<16x32xbf16>, vector<32x10xbf16>, vector<16x10xf32> -> vector<16x10xf32>
    %c0_27 = arith.constant 0 : index
    %c0_28 = arith.constant 0 : index
    %36 = vector.load %arg11[%c0_27, %c0_28] : memref<1x10xf32, #tpu.memory_space<vmem>>, vector<1x10xf32>
    %37 = vector.broadcast %36 : vector<1x10xf32> to vector<16x10xf32>
    %38 = arith.addf %35, %37 : vector<16x10xf32>
    %c0_29 = arith.constant 0 : index
    %c0_30 = arith.constant 0 : index
    %39 = vector.load %arg12[%c0_29, %c0_30] : memref<16x10xf32, #tpu.memory_space<vmem>>, vector<16x10xf32>
    tpu.vector_store %arg12[%c0_29, %c0_30], %38 {strides = array<i32>} : memref<16x10xf32, #tpu.memory_space<vmem>>, vector<16x10xf32>,
    return
  }
  func.func @transform_0(%arg0: i32) -> (i32, i32) {
    %c0_i32 = arith.constant 0 : i32
    %c0_i32_0 = arith.constant 0 : i32
    return %arg0, %c0_i32 : i32, i32
  }
  func.func @transform_1(%arg0: i32) -> (i32, i32) {
    %c0_i32 = arith.constant 0 : i32
    %c0_i32_0 = arith.constant 0 : i32
    %c0_i32_1 = arith.constant 0 : i32
    return %c0_i32, %c0_i32_0 : i32, i32
  }
  func.func @transform_2(%arg0: i32) -> (i32, i32) {
    %c0_i32 = arith.constant 0 : i32
    %c0_i32_0 = arith.constant 0 : i32
    %c0_i32_1 = arith.constant 0 : i32
    return %c0_i32, %c0_i32_0 : i32, i32
  }
  func.func @transform_3(%arg0: i32) -> (i32, i32) {
    %c0_i32 = arith.constant 0 : i32
    %c0_i32_0 = arith.constant 0 : i32
    %c0_i32_1 = arith.constant 0 : i32
    return %c0_i32, %c0_i32_0 : i32, i32
  }
  func.func @transform_4(%arg0: i32) -> (i32, i32) {
    %c0_i32 = arith.constant 0 : i32
    %c0_i32_0 = arith.constant 0 : i32
    %c0_i32_1 = arith.constant 0 : i32
    return %c0_i32, %c0_i32_0 : i32, i32
  }
  func.func @transform_5(%arg0: i32) -> (i32, i32) {
    %c0_i32 = arith.constant 0 : i32
    %c0_i32_0 = arith.constant 0 : i32
    %c0_i32_1 = arith.constant 0 : i32
    return %c0_i32, %c0_i32_0 : i32, i32
  }
  func.func @transform_6(%arg0: i32) -> (i32, i32) {
    %c0_i32 = arith.constant 0 : i32
    %c0_i32_0 = arith.constant 0 : i32
    %c0_i32_1 = arith.constant 0 : i32
    return %c0_i32, %c0_i32_0 : i32, i32
  }
  func.func @transform_7(%arg0: i32) -> (i32, i32) {
    %c0_i32 = arith.constant 0 : i32
    %c0_i32_0 = arith.constant 0 : i32
    %c0_i32_1 = arith.constant 0 : i32
    return %c0_i32, %c0_i32_0 : i32, i32
  }
  func.func @transform_8(%arg0: i32) -> (i32, i32) {
    %c0_i32 = arith.constant 0 : i32
    %c0_i32_0 = arith.constant 0 : i32
    %c0_i32_1 = arith.constant 0 : i32
    return %c0_i32, %c0_i32_0 : i32, i32
  }
  func.func @transform_9(%arg0: i32) -> (i32, i32) {
    %c0_i32 = arith.constant 0 : i32
    %c0_i32_0 = arith.constant 0 : i32
    %c0_i32_1 = arith.constant 0 : i32
    return %c0_i32, %c0_i32_0 : i32, i32
  }
  func.func @transform_10(%arg0: i32) -> (i32, i32) {
    %c0_i32 = arith.constant 0 : i32
    %c0_i32_0 = arith.constant 0 : i32
    %c0_i32_1 = arith.constant 0 : i32
    return %c0_i32, %c0_i32_0 : i32, i32
  }
  func.func @transform_11(%arg0: i32) -> (i32, i32) {
    %c0_i32 = arith.constant 0 : i32
    %c0_i32_0 = arith.constant 0 : i32
    return %arg0, %c0_i32 : i32, i32
  }
}

</mosaic_0001>

<bundles_post_ra>
// kernel: _forward_impl.1
= control target key start
LH: loop header
LB: loop body
LE: loop exit
PB: predicated region body
PF: predicated region fallthrough
CT: control target
= control target key end

     0   :  { %vm98_vm0 = vcmask 1046528   ;;  %vm99_vm1 = vcmask 1047552   ;;  %v691_v2 = vmov 65535   ;;  %vm94_vm2 = vcmask 515072   ;;  %s917_s1 = inlined_call_operand.vmem [shape: bf16[63,256], index: 1, kind: input, shape index: {}]   ;;  %s918_s3 = inlined_call_operand.vmem [shape: bf16[256,128], index: 3, kind: input, shape index: {}]   ;;  %s919_s0 = inlined_call_operand.vmem [shape: f32[16,63], index: 0, kind: input, shape index: {}]   ;;  %s920_s4 = inlined_call_operand.vmem [shape: f32[1,128], index: 4, kind: input, shape index: {}]   ;;  %s921_s5 = inlined_call_operand.vmem [shape: bf16[128,64], index: 5, kind: input, shape index: {}]   ;;  %s922_s2 = inlined_call_operand.vmem [shape: f32[1,256], index: 2, kind: input, shape index: {}]   ;;  %s923_s6 = inlined_call_operand.vmem [shape: f32[1,64], index: 6, kind: input, shape index: {}]   ;;  %s924_s7 = inlined_call_operand.vmem [shape: bf16[64,32], index: 7, kind: input, shape index: {}]   ;;  %s925_s8 = inlined_call_operand.vmem [shape: f32[1,32], index: 8, kind: input, shape index: {}]   ;;  %s926_s9 = inlined_call_operand.vmem [shape: bf16[32,10], index: 9, kind: input, shape index: {}]   ;;  %s927_s10 = inlined_call_operand.vmem [shape: f32[1,10], index: 10, kind: input, shape index: {}]   ;;  %s928_s11 = inlined_call_operand.vmem [shape: f32[16,10], index: 11, kind: output, shape index: {}]  }
   0x1   :  { %v518_v0 = vld [vmem:[%s917_s1 + $0x30] sm:$0xf]  ;;  %v655_v1 = vld [vmem:[%s917_s1 + $0x34] sm:$0xf0]  ;;  %v100_v3 = vsel %vm98_vm0, 4294967295, %v691_v2  ;;  %v661_v31 = vld [vmem:[%s918_s3 + $0x28] sm:$0xff] }
   0x2   :  { %v519_v4 = vor.u32 %v655_v1, %v518_v0  ;;  %v101_v5 = vsel %vm99_vm1, %v100_v3, 0  ;;  %v654_v6 = vld [vmem:[%s917_s1 + $0x34] sm:$0xf]  ;;  %v520_v7 = vld [vmem:[%s917_s1 + $0x38] sm:$0xf0]  ;;  %v669_v32 = vld [vmem:[%s918_s3 + $0x68] sm:$0xff] }
   0x3   :  { %v523_v8 = vor.u32 %v654_v6, %v520_v7  ;;  %v510_v9 = vld [vmem:[%s917_s1 + $0x20] sm:$0xf]  ;;  %v653_v10 = vld [vmem:[%s917_s1 + $0x24] sm:$0xf0]  ;;  %v652_v12 = vld [vmem:[%s917_s1 + $0x24] sm:$0xf] }
   0x4   :  { %v103_v11 = vand.u32 %v519_v4, %v101_v5  ;;  %v512_v13 = vld [vmem:[%s917_s1 + $0x28] sm:$0xf0]  ;;  %v511_v15 = vor.u32 %v653_v10, %v510_v9  ;;  %v502_v16 = vld [vmem:[%s917_s1 + $0x10] sm:$0xf]  ;;  %v651_v18 = vld [vmem:[%s917_s1 + $0x14] sm:$0xf0] }
   0x5   :  { %v106_v14 = vand.u32 %v523_v8, %v101_v5  ;;  %v515_v17 = vor.u32 %v652_v12, %v512_v13  ;;  %v663_v19 = vld [vmem:[%s918_s3 + $0x38] sm:$0xff]  ;;  %v650_v21 = vld [vmem:[%s917_s1 + $0x14] sm:$0xf]  ;;  %v503_v25 = vor.u32 %v651_v18, %v502_v16  ;;  %v494_v27 = vld [vmem:[%s917_s1] sm:$0xf]  ;;  %vm426_vm3 = vcmask 523264  }
   0x6   :  { %112 = vmatpush.bf16.msra.mxu0 %v103_v11  ;;  %v671_v20 = vld [vmem:[%s918_s3 + $0x78] sm:$0xff]  ;;  %274 = vmatpush.bf16.msra.mxu2 %v663_v19  ;;  %v662_v23 = vld [vmem:[%s918_s3 + $0x30] sm:$0xff]  ;;  %v649_v28 = vld [vmem:[%s917_s1 + $0x4] sm:$0xf0]  ;;  %vm467_vm4 = vcmask 261120   ;;  %vm485_vm5 = vcmask 80896  }
   0x7   :  { %126 = vmatpush.bf16.msra.mxu1 %v106_v14  ;;  %v504_v22 = vld [vmem:[%s917_s1 + $0x18] sm:$0xf0]  ;;  %288 = vmatpush.bf16.msra.mxu3 %v671_v20  ;;  %v670_v24 = vld [vmem:[%s918_s3 + $0x70] sm:$0xff]  ;;  %v648_v29 = vld [vmem:[%s917_s1 + $0x4] sm:$0xf]  ;;  %v495_v33 = vor.u32 %v649_v28, %v494_v27 }
   0x8   :  { %v507_v26 = vor.u32 %v650_v21, %v504_v22  ;;  %v496_v30 = vld [vmem:[%s917_s1 + $0x8] sm:$0xf0]  ;;  %v39_v34 = vld [vmem:[%s919_s0] sm:$0xff]  ;;  %v659_v40 = vld [vmem:[%s918_s3 + $0x18] sm:$0xff] }
   0x9   :  { %v40_v35 = vld [vmem:[%s919_s0 + $0x8] sm:$0xff]  ;;  %v499_v36 = vor.u32 %v648_v29, %v496_v30  ;;  %v660_v38 = vld [vmem:[%s918_s3 + $0x20] sm:$0xff]  ;;  %v667_v41 = vld [vmem:[%s918_s3 + $0x58] sm:$0xff] }
   0xa   :  { %113 = vmatpush.bf16.msra.mxu0 %v511_v15  ;;  %275 = vmatpush.bf16.msra.mxu2 %v662_v23  ;;  %v41_v37 = vpack.c.bf16 %v40_v35, %v39_v34  ;;  %v668_v39 = vld [vmem:[%s918_s3 + $0x60] sm:$0xff]  ;;  %v658_v42 = vld [vmem:[%s918_s3 + $0x10] sm:$0xff]  ;;  %v657_v44 = vld [vmem:[%s918_s3 + $0x8] sm:$0xff] }
   0xb   :  { %127 = vmatpush.bf16.msra.mxu1 %v515_v17  ;;  %289 = vmatpush.bf16.msra.mxu3 %v670_v24  ;;  %v666_v43 = vld [vmem:[%s918_s3 + $0x50] sm:$0xff]  ;;  %v665_v45 = vld [vmem:[%s918_s3 + $0x48] sm:$0xff]  ;;  %v656_v46 = vld [vmem:[%s918_s3] sm:$0xff] }
   0xc   :  { %v664_v47 = vld [vmem:[%s918_s3 + $0x40] sm:$0xff]  ;;  %v679_v48 = vld [vmem:[%s921_s5 + $0x38] sm:$0xff]  ;;  %v678_v49 = vld [vmem:[%s921_s5 + $0x30] sm:$0xff] }
   0xd   :  { %v677_v50 = vld [vmem:[%s921_s5 + $0x28] sm:$0xff]  ;;  %v676_v51 = vld [vmem:[%s921_s5 + $0x20] sm:$0xff]  ;;  %v675_v5 = vld [vmem:[%s921_s5 + $0x18] sm:$0xff] }
   0xe   :  { %114 = vmatpush.bf16.msra.mxu0 %v503_v25  ;;  %276 = vmatpush.bf16.msra.mxu2 %v661_v31  ;;  %v50_v52 = vld [vmem:[%s922_s2] sm:$0x3]  ;;  %v674_v6 = vld [vmem:[%s921_s5 + $0x10] sm:$0xff]  ;;  %v673_v7 = vld [vmem:[%s921_s5 + $0x8] sm:$0xff] }
   0xf   :  { %128 = vmatpush.bf16.msra.mxu1 %v507_v26  ;;  %290 = vmatpush.bf16.msra.mxu3 %v669_v32  ;;  %v52_v55 = vperm.slane %v50_v52, 0  ;;  %v53_v56 = vperm.slane %v50_v52, 1  ;;  %v672_v8 = vld [vmem:[%s921_s5] sm:$0xff]  ;;  %v683_v9 = vld [vmem:[%s924_s7 + $0x18] sm:$0xff]  ;;  %v682_v22 = vld [vmem:[%s924_s7 + $0x10] sm:$0xff] }
  0x10   :  { %v687_v11 = vld [vmem:[%s920_s4] ss:$0 sm:$0xff]  ;;  %v681_v23 = vld [vmem:[%s924_s7 + $0x8] sm:$0xff] }
  0x11   :  { %v680_v24 = vld [vmem:[%s924_s7] sm:$0xff]  ;;  %v685_v25 = vld [vmem:[%s926_s9 + $0x8] sm:$0xff] }
  0x12   :  { %115 = vmatpush.bf16.msra.mxu0 %v495_v33  ;;  %277 = vmatpush.bf16.msra.mxu2 %v660_v38  ;;  %v688_v27 = vld [vmem:[%s923_s6] ss:$0 sm:$0xff] }
  0x13   :  { %129 = vmatpush.bf16.msra.mxu1 %v499_v36  ;;  %291 = vmatpush.bf16.msra.mxu3 %v668_v39  ;;  %v684_v34 = vld [vmem:[%s926_s9] sm:$0xff] }
  0x14   :  { %v689_v36 = vld [vmem:[%s925_s8] ss:$0 sm:$0xff] }
  0x15   :  { %524 = vmatmul.msk.bf16.vlgmr.msra.gmra.mxu0 %vm94_vm2, %v41_v37 }
  0x16   :  { %525 = vmatmul.msk.bf16.vlgmr.msra.gmra.mxu1 %vm94_vm2, %v41_v37  ;;  %278 = vmatpush.bf16.msra.mxu2 %v659_v40 }
  0x17   :  { %292 = vmatpush.bf16.msra.mxu3 %v667_v41  ;;  %373 = vmatpush.bf16.msrb.mxu0 %v679_v48 }
  0x18   :  { %434 = vmatpush.bf16.msrb.mxu1 %v683_v9 }
  0x1a   :  { %279 = vmatpush.bf16.msra.mxu2 %v658_v42 }
  0x1b   :  { %293 = vmatpush.bf16.msra.mxu3 %v666_v43  ;;  %374 = vmatpush.bf16.msrb.mxu0 %v678_v49  ;;  %v690_v43 = vld [vmem:[%s927_s10] ss:$0 sm:$0xff] }
  0x1c   :  { %435 = vmatpush.bf16.msrb.mxu1 %v682_v22 }
  0x1e   :  { %280 = vmatpush.bf16.msra.mxu2 %v657_v44 }
  0x1f   :  { %294 = vmatpush.bf16.msra.mxu3 %v665_v45  ;;  %375 = vmatpush.bf16.msrb.mxu0 %v677_v50 }
  0x20   :  { %436 = vmatpush.bf16.msrb.mxu1 %v681_v23 }
  0x22   :  { %281 = vmatpush.bf16.msra.mxu2 %v656_v46 }
  0x23   :  { %295 = vmatpush.bf16.msra.mxu3 %v664_v47  ;;  %376 = vmatpush.bf16.msrb.mxu0 %v676_v51 }
  0x24   :  { %437 = vmatpush.bf16.msrb.mxu1 %v680_v24 }
  0x27   :  { %377 = vmatpush.bf16.msrb.mxu0 %v675_v5 }
  0x28   :  { %477 = vmatpush.bf16.msra.mxu1 %v685_v25 }
  0x2b   :  { %378 = vmatpush.bf16.msrb.mxu0 %v674_v6 }
  0x2c   :  { %478 = vmatpush.bf16.msra.mxu1 %v684_v34 }
  0x2f   :  { %379 = vmatpush.bf16.msrb.mxu0 %v673_v7 }
  0x33   :  { %380 = vmatpush.bf16.msrb.mxu0 %v672_v8 }
  0x92   :  { %v117_v53 = vpop.f32.mrf.mxu0 }
  0x93   :  { %v131_v54 = vpop.f32.mrf.mxu1  ;;  %v118_v57 = vadd.f32 %v117_v53, %v52_v55 }
  0x94   :  { %v132_v58 = vadd.f32 %v131_v54, %v53_v56 }
  0x95   :  { %v136_v63 = vmax.f32 %v118_v57, 0.0 }
  0x96   :  { %v137_v1 = vmax.f32 %v132_v58, 0.0 }
  0x9a   :  { %v119_v59 = vpop.f32.mrf.mxu0 }
  0x9b   :  { %v120_v60 = vadd.f32 %v119_v59, %v52_v55  ;;  %v133_v61 = vpop.f32.mrf.mxu1 }
  0x9c   :  { %v134_v62 = vadd.f32 %v133_v61, %v53_v56 }
  0x9d   :  { %v138_v0 = vmax.f32 %v120_v60, 0.0 }
  0x9e   :  { %v139_v2 = vmax.f32 %v134_v62, 0.0 }
  0x9f   :  { %v140_v3 = vpack.c.bf16 %v138_v0, %v136_v63 }
  0xa0   :  { %v141_v4 = vpack.c.bf16 %v139_v2, %v137_v1 }
  0xa1   :  { %282 = vmatmul.bf16.vlgmr.msra.gmra.mxu2 %v140_v3 }
  0xa2   :  { %296 = vmatmul.bf16.vlgmr.msra.gmra.mxu3 %v141_v4 }
 0x124   :  { %v283_v10 = vpop.f32.mrf.mxu2 }
 0x125   :  { %v297_v12 = vpop.f32.mrf.mxu3  ;;  %v284_v13 = vadd.f32 %v687_v11, %v283_v10 }
 0x127   :  { %v298_v15 = vadd.f32 %v297_v12, %v284_v13 }
 0x129   :  { %v302_v19 = vmax.f32 %v298_v15, 0.0 }
 0x12c   :  { %v285_v14 = vpop.f32.mrf.mxu2 }
 0x12d   :  { %v286_v16 = vadd.f32 %v687_v11, %v285_v14  ;;  %v299_v17 = vpop.f32.mrf.mxu3 }
 0x12f   :  { %v300_v18 = vadd.f32 %v299_v17, %v286_v16 }
 0x131   :  { %v303_v20 = vmax.f32 %v300_v18, 0.0 }
 0x133   :  { %v304_v21 = vpack.c.bf16 %v303_v20, %v302_v19 }
 0x135   :  { %381 = vmatmul.bf16.vlgmr.msrb.gmra.mxu0 %v304_v21 }
 0x1b2   :  { %v382_v26 = vpop.f32.mrf.mxu0 }
 0x1b3   :  { %v383_v28 = vadd.f32 %v688_v27, %v382_v26 }
 0x1b5   :  { %v387_v31 = vmax.f32 %v383_v28, 0.0 }
 0x1ba   :  { %v384_v29 = vpop.f32.mrf.mxu0 }
 0x1bb   :  { %v385_v30 = vadd.f32 %v688_v27, %v384_v29 }
 0x1bd   :  { %v388_v32 = vmax.f32 %v385_v30, 0.0 }
 0x1bf   :  { %v389_v33 = vpack.c.bf16 %v388_v32, %v387_v31 }
 0x1c1   :  { %638 = vmatmul.msk.bf16.vlgmr.msrb.gmra.mxu1 %vm426_vm3, %v389_v33 }
 0x23e   :  { %v439_v35 = vpop.f32.mrf.mxu1 }
 0x23f   :  { %v440_v37 = vadd.f32 %v689_v36, %v439_v35 }
 0x241   :  { %v444_v40 = vmax.f32 %v440_v37, 0.0 }
 0x246   :  { %v441_v38 = vpop.f32.mrf.mxu1 }
 0x247   :  { %v442_v39 = vadd.f32 %v689_v36, %v441_v38 }
 0x249   :  { %v445_v41 = vmax.f32 %v442_v39, 0.0 }
 0x24b   :  { %v446_v42 = vpack.c.bf16 %v445_v41, %v444_v40 }
 0x24d   :  { %647 = vmatmul.msk.bf16.vlgmr.msra.gmra.mxu1 %vm467_vm4, %v446_v42 }
 0x2ca   :  { %v480_v44 = vpop.f32.mrf.mxu1 }
 0x2cb   :  { %v481_v45 = vadd.f32 %v690_v43, %v480_v44 }
 0x2cd   :  { %486 = vst.msk [vmem:[%s928_s11] sm:$0xff] %vm485_vm5, %v481_v45 }
 0x2d2   :  { %v482_v46 = vpop.f32.mrf.mxu1 }
 0x2d3   :  { %v483_v47 = vadd.f32 %v690_v43, %v482_v46 }
 0x2d5   :  { %487 = vst.msk [vmem:[%s928_s11 + $0x8] sm:$0xff] %vm485_vm5, %v483_v47 }

</bundles_post_ra>
